<compile_context>
chip_gen: v7x
topology: tpu7x:2x2x1
jax: 0.10.0
libtpu: 0.0.40
codegen_flags: <defaults>
</compile_context>

<pallas_src>
import jax
import jax.numpy as jnp
from jax.experimental import pallas as pl
from jax.experimental.pallas import tpu as pltpu

LANE = 128      # pad feature axes to multiples of the lane width
SUBLANE = 8     # batch tiles in multiples of the sublane count


def _round_up(n, m):
    return (n + m - 1) // m * m


def _pad2d(a, rows, cols):
    r, c = a.shape
    return jnp.pad(a, ((0, rows - r), (0, cols - c)))


# ----------------------------------------------------------------------------
# Pallas kernel: fused MLP forward for one (block_m, F) batch tile.
# ----------------------------------------------------------------------------
def _mlp_kernel(x_ref, w1_ref, b1_ref, w2p_ref, w2n_ref, b2_ref,
                w3p_ref, w3n_ref, b3_ref, o_ref):
    cdt = w1_ref.dtype  # MXU operand dtype (bf16)

    # dense1 (BN1 + weight_norm pre-folded into w1/b1)
    h1 = jnp.dot(x_ref[...], w1_ref[...],
                 preferred_element_type=jnp.float32) + b1_ref[...]

    # CReLU -> BN2 -> dense2 (concat-free; BN2 folded into w2p/w2n/b2):
    #   cat(relu(h1), min(h1,0)) @ W2' == relu(h1)@W2'_top + min(h1,0)@W2'_bot
    h2 = (jnp.dot(jnp.maximum(h1, 0.0).astype(cdt), w2p_ref[...],
                  preferred_element_type=jnp.float32)
          + jnp.dot(jnp.minimum(h1, 0.0).astype(cdt), w2n_ref[...],
                    preferred_element_type=jnp.float32)
          + b2_ref[...])

    # CReLU -> BN3 -> dense3 (weight_norm + BN3 folded), concat-free again.
    o_ref[...] = (jnp.dot(jnp.maximum(h2, 0.0).astype(cdt), w3p_ref[...],
                          preferred_element_type=jnp.float32)
                  + jnp.dot(jnp.minimum(h2, 0.0).astype(cdt), w3n_ref[...],
                            preferred_element_type=jnp.float32)
                  + b3_ref[...]).astype(o_ref.dtype)


# ----------------------------------------------------------------------------
# Wrapper: BlockSpecs / grid / VMEM budget, launches the kernel.
# ----------------------------------------------------------------------------
def single_input_model_forward(x, kp, *, block_m=None):
    """x: (B, F) float array; kp: folded/padded params from fold_params()."""
    B, F = x.shape
    assert F == kp["num_features"]
    T = kp["num_targets"]
    Fp, Hp = kp["w1"].shape
    Tp = kp["w3p"].shape[1]

    if block_m is None:
        # Multiple grid steps enable pipelining and (on v7x) both TensorCores;
        # at tiny F/H/T larger tiles amortize the ~0.35us per-step overhead.
        block_m = min(_round_up(B, SUBLANE), 512)
    block_m = _round_up(block_m, SUBLANE)
    Bp = _round_up(max(B, block_m), block_m)

    cdt = kp["w1"].dtype
    xp = _pad2d(x.astype(cdt), Bp, Fp)

    full = lambda shape: pl.BlockSpec(shape, lambda i: (0, 0))
    in_specs = [
        pl.BlockSpec((block_m, Fp), lambda i: (i, 0)),    # x, tiled on batch
        full((Fp, Hp)), full((1, Hp)),                    # W1', b1'
        full((Hp, Hp)), full((Hp, Hp)), full((1, Hp)),    # W2'_top, W2'_bot, b2'
        full((Hp, Tp)), full((Hp, Tp)), full((1, Tp)),    # W3'_top, W3'_bot, b3'
    ]
    out_specs = pl.BlockSpec((block_m, Tp), lambda i: (i, 0))

    # VMEM budget: Pallas double-buffers every operand; keep the scoped limit
    # above that (>= 32 MiB default, capped at 128 MiB).
    # TODO(synk): on v7x (64 MiB VMEM) single-buffer the constant-index weight
    # specs (pipeline_mode=pl.Buffered(1)) instead of only raising the limit.
    cbytes = jnp.dtype(cdt).itemsize
    weight_bytes = (Fp * Hp + 2 * Hp * Hp + 2 * Hp * Tp) * cbytes
    bias_bytes = (2 * Hp + Tp) * 4
    act_bytes = block_m * (Fp * cbytes + Tp * 4)
    vmem_limit = int(min(128 << 20,
                         max(32 << 20,
                             2 * (weight_bytes + bias_bytes + act_bytes) + (4 << 20))))

    out = pl.pallas_call(
        _mlp_kernel,
        out_shape=jax.ShapeDtypeStruct((Bp, Tp), jnp.float32),
        grid=(Bp // block_m,),
        in_specs=in_specs,
        out_specs=out_specs,
        compiler_params=pltpu.CompilerParams(
            dimension_semantics=("parallel",),
            vmem_limit_bytes=vmem_limit),
    )(xp, kp["w1"], kp["b1"], kp["w2p"], kp["w2n"], kp["b2"],
      kp["w3p"], kp["w3n"], kp["b3"])

    return out[:B, :T]


# ----------------------------------------------------------------------------
# Parameter construction (mirrors the PyTorch module's state) and folding.
# ----------------------------------------------------------------------------
def make_raw_params(key, num_features, hidden_size, num_targets):
    """Deterministic parameters mirroring the PyTorch module (eval mode)."""
    f32 = jnp.float32
    ks = jax.random.split(key, 20)
    rnd = lambda k, shape, s=0.1: (s * jax.random.normal(k, shape)).astype(f32)

    def bn(k0, k1, k2, k3, c):
        return dict(gamma=1.0 + rnd(k0, (c,)), beta=rnd(k1, (c,)),
                    mean=rnd(k2, (c,)), var=0.5 + jnp.abs(rnd(k3, (c,))))

    return dict(
        bn1=bn(ks[0], ks[1], ks[2], ks[3], num_features),
        d1_v=rnd(ks[4], (hidden_size, num_features), 0.2),   # weight_norm v
        d1_g=1.0 + rnd(ks[5], (hidden_size,)),               # weight_norm g
        d1_b=rnd(ks[6], (hidden_size,)),
        bn2=bn(ks[7], ks[8], ks[9], ks[10], 2 * hidden_size),
        d2_w=rnd(ks[11], (hidden_size, 2 * hidden_size), 0.2),  # (out, in)
        d2_b=rnd(ks[12], (hidden_size,)),
        bn3=bn(ks[13], ks[14], ks[15], ks[16], 2 * hidden_size),
        d3_v=rnd(ks[17], (num_targets, 2 * hidden_size), 0.2),
        d3_g=1.0 + rnd(ks[18], (num_targets,)),
        d3_b=rnd(ks[19], (num_targets,)),
    )


def _bn_scale_shift(bn, eps=1e-5):
    scale = bn["gamma"] / jnp.sqrt(bn["var"] + eps)
    shift = bn["beta"] - bn["mean"] * scale
    return scale, shift


def _weight_norm(v, g):
    # PyTorch weight_norm (dim=0): W[o, :] = g[o] * v[o, :] / ||v[o, :]||
    w = g[:, None] * v / jnp.sqrt(jnp.sum(v * v, axis=1, keepdims=True))
    return w.T  # (in, out)


def fold_params(raw, num_features, hidden_size, num_targets,
                compute_dtype=jnp.bfloat16):
    """Fold BN (inference), weight_norm and the CReLU concat into 5 weight
    matrices + 3 biases, zero-padded to lane-aligned shapes, MXU-ready."""
    H = hidden_size
    s1, t1 = _bn_scale_shift(raw["bn1"])
    s2, t2 = _bn_scale_shift(raw["bn2"])
    s3, t3 = _bn_scale_shift(raw["bn3"])

    w1 = _weight_norm(raw["d1_v"], raw["d1_g"])   # (F, H)
    w2 = raw["d2_w"].T                            # (2H, H)
    w3 = _weight_norm(raw["d3_v"], raw["d3_g"])   # (2H, T)

    # (x*s + t) @ W + b  ==  x @ (s[:,None]*W) + (t @ W + b)
    w1f = s1[:, None] * w1
    b1f = t1 @ w1 + raw["d1_b"]
    w2f = s2[:, None] * w2
    b2f = t2 @ w2 + raw["d2_b"]
    w3f = s3[:, None] * w3
    b3f = t3 @ w3 + raw["d3_b"]

    Fp = _round_up(num_features, LANE)
    Hp = _round_up(hidden_size, LANE)
    Tp = _round_up(num_targets, LANE)
    cdt = jnp.dtype(compute_dtype)

    return dict(
        num_features=num_features, num_targets=num_targets,
        w1=_pad2d(w1f, Fp, Hp).astype(cdt),
        b1=_pad2d(b1f[None, :], 1, Hp).astype(jnp.float32),
        w2p=_pad2d(w2f[:H, :], Hp, Hp).astype(cdt),
        w2n=_pad2d(w2f[H:, :], Hp, Hp).astype(cdt),
        b2=_pad2d(b2f[None, :], 1, Hp).astype(jnp.float32),
        w3p=_pad2d(w3f[:H, :], Hp, Tp).astype(cdt),
        w3n=_pad2d(w3f[H:, :], Hp, Tp).astype(cdt),
        b3=_pad2d(b3f[None, :], 1, Tp).astype(jnp.float32),
    )


# ----------------------------------------------------------------------------
# Pure-JAX references for correctness checks.
# ----------------------------------------------------------------------------
def reference_unfused(x, raw, eps=1e-5):
    """Straight f32 transcription of the PyTorch forward (eval mode)."""
    hp = jax.lax.Precision.HIGHEST

    def bn(h, p):
        return (h - p["mean"]) / jnp.sqrt(p["var"] + eps) * p["gamma"] + p["beta"]

    def crelu(h):  # cat(relu(x), -relu(-x))
        return jnp.concatenate([jnp.maximum(h, 0.0), -jnp.maximum(-h, 0.0)], axis=1)

    w1 = _weight_norm(raw["d1_v"], raw["d1_g"])
    w3 = _weight_norm(raw["d3_v"], raw["d3_g"])
    h = bn(x, raw["bn1"])
    h = crelu(jnp.dot(h, w1, precision=hp) + raw["d1_b"])
    h = bn(h, raw["bn2"])                                   # dropout2: identity (eval)
    h = crelu(jnp.dot(h, raw["d2_w"].T, precision=hp) + raw["d2_b"])
    h = bn(h, raw["bn3"])                                   # dropout3: identity (eval)
    return jnp.dot(h, w3, precision=hp) + raw["d3_b"]


def reference_folded(x, kp, precision=None):
    """Pure-JAX mirror of the fused kernel math (same folded params/dtypes)."""
    cdt = kp["w1"].dtype
    Fp = kp["w1"].shape[0]
    xp = _pad2d(x, x.shape[0], Fp).astype(cdt)
    dot = lambda a, b: jnp.dot(a, b, preferred_element_type=jnp.float32,
                               precision=precision)
    h1 = dot(xp, kp["w1"]) + kp["b1"]
    h2 = (dot(jnp.maximum(h1, 0.0).astype(cdt), kp["w2p"])
          + dot(jnp.minimum(h1, 0.0).astype(cdt), kp["w2n"]) + kp["b2"])
    out = (dot(jnp.maximum(h2, 0.0).astype(cdt), kp["w3p"])
           + dot(jnp.minimum(h2, 0.0).astype(cdt), kp["w3n"]) + kp["b3"])
    return out[:, :kp["num_targets"]]


if __name__ == "__main__":
    # Small deterministic example: batch=8, num_features=32, hidden=32, targets=8.
    B, F, H, T = 8, 32, 32, 8
    key = jax.random.PRNGKey(0)
    kx, kparam = jax.random.split(key)
    x = jax.random.normal(kx, (B, F), dtype=jnp.float32)

    raw = make_raw_params(kparam, F, H, T)
    kp = fold_params(raw, F, H, T, compute_dtype=jnp.bfloat16)

    out = single_input_model_forward(x, kp)
    out = jax.block_until_ready(out)
    assert out.shape == (B, T)

    # 1) Kernel vs pure-JAX mirror with identical folded bf16 params (tight).
    ref_fold = reference_folded(x, kp)
    assert jnp.allclose(out, ref_fold, atol=2e-2, rtol=2e-2), \
        "kernel mismatch vs folded reference"

    # 2) Folding algebra (f32, highest precision) vs the original module math.
    kp32 = fold_params(raw, F, H, T, compute_dtype=jnp.float32)
    ref_fold32 = reference_folded(x, kp32, precision=jax.lax.Precision.HIGHEST)
    ref = reference_unfused(x, raw)
    assert jnp.allclose(ref_fold32, ref, atol=1e-3, rtol=1e-3), \
        "BN/weight_norm/CReLU folding mismatch vs module math"

    # 3) End-to-end sanity (bf16 quantization expected): loose tolerance.
    assert jnp.allclose(out, ref, atol=1e-1, rtol=1e-1), \
        "kernel mismatch vs f32 module reference"

    print("KERNEL_OK")
</pallas_src>

<mosaic_0001>
module attributes {stable_mosaic.version = 11 : i64} {
  func.func @_mlp_kernel(%arg0: i32, %arg1: memref<8x128xbf16, #tpu.memory_space<vmem>>, %arg2: memref<128x128xbf16, #tpu.memory_space<vmem>>, %arg3: memref<1x128xf32, #tpu.memory_space<vmem>>, %arg4: memref<128x128xbf16, #tpu.memory_space<vmem>>, %arg5: memref<128x128xbf16, #tpu.memory_space<vmem>>, %arg6: memref<1x128xf32, #tpu.memory_space<vmem>>, %arg7: memref<128x128xbf16, #tpu.memory_space<vmem>>, %arg8: memref<128x128xbf16, #tpu.memory_space<vmem>>, %arg9: memref<1x128xf32, #tpu.memory_space<vmem>>, %arg10: memref<8x128xf32, #tpu.memory_space<vmem>>) attributes {dimension_semantics = [#tpu.dimension_semantics<parallel>], iteration_bounds = array<i64: 1>, scalar_prefetch = 0 : i64, scratch_operands = 0 : i64, tpu.core_type = #tpu.core_type<tc>, window_params = [{transform_indices = @transform_0, window_bounds = array<i64: 8, 128>}, {pipeline_mode = #tpu.pipeline_mode<synchronous>, transform_indices = @transform_1, window_bounds = array<i64: 128, 128>}, {pipeline_mode = #tpu.pipeline_mode<synchronous>, transform_indices = @transform_2, window_bounds = array<i64: 1, 128>}, {pipeline_mode = #tpu.pipeline_mode<synchronous>, transform_indices = @transform_3, window_bounds = array<i64: 128, 128>}, {pipeline_mode = #tpu.pipeline_mode<synchronous>, transform_indices = @transform_4, window_bounds = array<i64: 128, 128>}, {pipeline_mode = #tpu.pipeline_mode<synchronous>, transform_indices = @transform_5, window_bounds = array<i64: 1, 128>}, {pipeline_mode = #tpu.pipeline_mode<synchronous>, transform_indices = @transform_6, window_bounds = array<i64: 128, 128>}, {pipeline_mode = #tpu.pipeline_mode<synchronous>, transform_indices = @transform_7, window_bounds = array<i64: 128, 128>}, {pipeline_mode = #tpu.pipeline_mode<synchronous>, transform_indices = @transform_8, window_bounds = array<i64: 1, 128>}, {transform_indices = @transform_9, window_bounds = array<i64: 8, 128>}]} {
    %c0 = arith.constant 0 : index
    %c0_0 = arith.constant 0 : index
    %0 = vector.load %arg1[%c0, %c0_0] : memref<8x128xbf16, #tpu.memory_space<vmem>>, vector<8x128xbf16>
    %c0_1 = arith.constant 0 : index
    %c0_2 = arith.constant 0 : index
    %1 = vector.load %arg2[%c0_1, %c0_2] : memref<128x128xbf16, #tpu.memory_space<vmem>>, vector<128x128xbf16>
    %cst = arith.constant dense<0.000000e+00> : vector<8x128xf32>
    %2 = tpu.matmul %0, %1, %cst {dimension_numbers = #tpu.dot_dimension_numbers<[1], [0], [0], [1], [0, 0, 1, 1], [], []>} : vector<8x128xbf16>, vector<128x128xbf16>, vector<8x128xf32> -> vector<8x128xf32>
    %c0_3 = arith.constant 0 : index
    %c0_4 = arith.constant 0 : index
    %3 = vector.load %arg3[%c0_3, %c0_4] : memref<1x128xf32, #tpu.memory_space<vmem>>, vector<1x128xf32>
    %4 = vector.broadcast %3 : vector<1x128xf32> to vector<8x128xf32>
    %5 = arith.addf %2, %4 : vector<8x128xf32>
    %cst_5 = arith.constant 0.000000e+00 : f32
    %6 = vector.broadcast %cst_5 : f32 to vector<8x128xf32>
    %7 = arith.maximumf %5, %6 : vector<8x128xf32>
    %8 = arith.truncf %7 : vector<8x128xf32> to vector<8x128xbf16>
    %c0_6 = arith.constant 0 : index
    %c0_7 = arith.constant 0 : index
    %9 = vector.load %arg4[%c0_6, %c0_7] : memref<128x128xbf16, #tpu.memory_space<vmem>>, vector<128x128xbf16>
    %cst_8 = arith.constant dense<0.000000e+00> : vector<8x128xf32>
    %10 = tpu.matmul %8, %9, %cst_8 {dimension_numbers = #tpu.dot_dimension_numbers<[1], [0], [0], [1], [0, 0, 1, 1], [], []>} : vector<8x128xbf16>, vector<128x128xbf16>, vector<8x128xf32> -> vector<8x128xf32>
    %cst_9 = arith.constant 0.000000e+00 : f32
    %11 = vector.broadcast %cst_9 : f32 to vector<8x128xf32>
    %12 = arith.minimumf %5, %11 : vector<8x128xf32>
    %13 = arith.truncf %12 : vector<8x128xf32> to vector<8x128xbf16>
    %c0_10 = arith.constant 0 : index
    %c0_11 = arith.constant 0 : index
    %14 = vector.load %arg5[%c0_10, %c0_11] : memref<128x128xbf16, #tpu.memory_space<vmem>>, vector<128x128xbf16>
    %cst_12 = arith.constant dense<0.000000e+00> : vector<8x128xf32>
    %15 = tpu.matmul %13, %14, %cst_12 {dimension_numbers = #tpu.dot_dimension_numbers<[1], [0], [0], [1], [0, 0, 1, 1], [], []>} : vector<8x128xbf16>, vector<128x128xbf16>, vector<8x128xf32> -> vector<8x128xf32>
    %16 = arith.addf %10, %15 : vector<8x128xf32>
    %c0_13 = arith.constant 0 : index
    %c0_14 = arith.constant 0 : index
    %17 = vector.load %arg6[%c0_13, %c0_14] : memref<1x128xf32, #tpu.memory_space<vmem>>, vector<1x128xf32>
    %18 = vector.broadcast %17 : vector<1x128xf32> to vector<8x128xf32>
    %19 = arith.addf %16, %18 : vector<8x128xf32>
    %cst_15 = arith.constant 0.000000e+00 : f32
    %20 = vector.broadcast %cst_15 : f32 to vector<8x128xf32>
    %21 = arith.maximumf %19, %20 : vector<8x128xf32>
    %22 = arith.truncf %21 : vector<8x128xf32> to vector<8x128xbf16>
    %c0_16 = arith.constant 0 : index
    %c0_17 = arith.constant 0 : index
    %23 = vector.load %arg7[%c0_16, %c0_17] : memref<128x128xbf16, #tpu.memory_space<vmem>>, vector<128x128xbf16>
    %cst_18 = arith.constant dense<0.000000e+00> : vector<8x128xf32>
    %24 = tpu.matmul %22, %23, %cst_18 {dimension_numbers = #tpu.dot_dimension_numbers<[1], [0], [0], [1], [0, 0, 1, 1], [], []>} : vector<8x128xbf16>, vector<128x128xbf16>, vector<8x128xf32> -> vector<8x128xf32>
    %cst_19 = arith.constant 0.000000e+00 : f32
    %25 = vector.broadcast %cst_19 : f32 to vector<8x128xf32>
    %26 = arith.minimumf %19, %25 : vector<8x128xf32>
    %27 = arith.truncf %26 : vector<8x128xf32> to vector<8x128xbf16>
    %c0_20 = arith.constant 0 : index
    %c0_21 = arith.constant 0 : index
    %28 = vector.load %arg8[%c0_20, %c0_21] : memref<128x128xbf16, #tpu.memory_space<vmem>>, vector<128x128xbf16>
    %cst_22 = arith.constant dense<0.000000e+00> : vector<8x128xf32>
    %29 = tpu.matmul %27, %28, %cst_22 {dimension_numbers = #tpu.dot_dimension_numbers<[1], [0], [0], [1], [0, 0, 1, 1], [], []>} : vector<8x128xbf16>, vector<128x128xbf16>, vector<8x128xf32> -> vector<8x128xf32>
    %30 = arith.addf %24, %29 : vector<8x128xf32>
    %c0_23 = arith.constant 0 : index
    %c0_24 = arith.constant 0 : index
    %31 = vector.load %arg9[%c0_23, %c0_24] : memref<1x128xf32, #tpu.memory_space<vmem>>, vector<1x128xf32>
    %32 = vector.broadcast %31 : vector<1x128xf32> to vector<8x128xf32>
    %33 = arith.addf %30, %32 : vector<8x128xf32>
    %c0_25 = arith.constant 0 : index
    %c0_26 = arith.constant 0 : index
    %34 = vector.load %arg10[%c0_25, %c0_26] : memref<8x128xf32, #tpu.memory_space<vmem>>, vector<8x128xf32>
    tpu.vector_store %arg10[%c0_25, %c0_26], %33 {strides = array<i32>} : memref<8x128xf32, #tpu.memory_space<vmem>>, vector<8x128xf32>,
    return
  }
  func.func @transform_0(%arg0: i32) -> (i32, i32) {
    %c0_i32 = arith.constant 0 : i32
    %c0_i32_0 = arith.constant 0 : i32
    return %arg0, %c0_i32 : i32, i32
  }
  func.func @transform_1(%arg0: i32) -> (i32, i32) {
    %c0_i32 = arith.constant 0 : i32
    %c0_i32_0 = arith.constant 0 : i32
    %c0_i32_1 = arith.constant 0 : i32
    return %c0_i32, %c0_i32_0 : i32, i32
  }
  func.func @transform_2(%arg0: i32) -> (i32, i32) {
    %c0_i32 = arith.constant 0 : i32
    %c0_i32_0 = arith.constant 0 : i32
    %c0_i32_1 = arith.constant 0 : i32
    return %c0_i32, %c0_i32_0 : i32, i32
  }
  func.func @transform_3(%arg0: i32) -> (i32, i32) {
    %c0_i32 = arith.constant 0 : i32
    %c0_i32_0 = arith.constant 0 : i32
    %c0_i32_1 = arith.constant 0 : i32
    return %c0_i32, %c0_i32_0 : i32, i32
  }
  func.func @transform_4(%arg0: i32) -> (i32, i32) {
    %c0_i32 = arith.constant 0 : i32
    %c0_i32_0 = arith.constant 0 : i32
    %c0_i32_1 = arith.constant 0 : i32
    return %c0_i32, %c0_i32_0 : i32, i32
  }
  func.func @transform_5(%arg0: i32) -> (i32, i32) {
    %c0_i32 = arith.constant 0 : i32
    %c0_i32_0 = arith.constant 0 : i32
    %c0_i32_1 = arith.constant 0 : i32
    return %c0_i32, %c0_i32_0 : i32, i32
  }
  func.func @transform_6(%arg0: i32) -> (i32, i32) {
    %c0_i32 = arith.constant 0 : i32
    %c0_i32_0 = arith.constant 0 : i32
    %c0_i32_1 = arith.constant 0 : i32
    return %c0_i32, %c0_i32_0 : i32, i32
  }
  func.func @transform_7(%arg0: i32) -> (i32, i32) {
    %c0_i32 = arith.constant 0 : i32
    %c0_i32_0 = arith.constant 0 : i32
    %c0_i32_1 = arith.constant 0 : i32
    return %c0_i32, %c0_i32_0 : i32, i32
  }
  func.func @transform_8(%arg0: i32) -> (i32, i32) {
    %c0_i32 = arith.constant 0 : i32
    %c0_i32_0 = arith.constant 0 : i32
    %c0_i32_1 = arith.constant 0 : i32
    return %c0_i32, %c0_i32_0 : i32, i32
  }
  func.func @transform_9(%arg0: i32) -> (i32, i32) {
    %c0_i32 = arith.constant 0 : i32
    %c0_i32_0 = arith.constant 0 : i32
    return %arg0, %c0_i32 : i32, i32
  }
}

</mosaic_0001>

<bundles_post_ra>
// kernel: tpu_custom_call.1
= control target key start
LH: loop header
LB: loop body
LE: loop exit
PB: predicated region body
PF: predicated region fallthrough
CT: control target
= control target key end

     0   :  { %14 = vsyncpa [#allocation3], 0  ;;  %s1307_s0 = inlined_call_operand.hbm [shape: bf16[8,128], index: 0, kind: input, shape index: {}]   ;;  %s1308_s1 = inlined_call_operand.hbm [shape: bf16[128,128], index: 1, kind: input, shape index: {}]   ;;  %s1309_s2 = inlined_call_operand.vmem [shape: f32[1,128], index: 2, kind: input, shape index: {}]   ;;  %s1310_s3 = inlined_call_operand.hbm [shape: bf16[128,128], index: 3, kind: input, shape index: {}]   ;;  %s1311_s4 = inlined_call_operand.hbm [shape: bf16[128,128], index: 4, kind: input, shape index: {}]   ;;  %s1312_s5 = inlined_call_operand.vmem [shape: f32[1,128], index: 5, kind: input, shape index: {}]   ;;  %s1313_s6 = inlined_call_operand.hbm [shape: bf16[128,128], index: 6, kind: input, shape index: {}]   ;;  %s1314_s7 = inlined_call_operand.hbm [shape: bf16[128,128], index: 7, kind: input, shape index: {}]   ;;  %s1315_s8 = inlined_call_operand.vmem [shape: f32[1,128], index: 8, kind: input, shape index: {}]   ;;  %s1316_s9 = inlined_call_operand.hbm [shape: f32[8,128], index: 9, kind: output, shape index: {}]  }
   0x1   :  { %15 = vsyncpa [#allocation6], 0 }
   0x2   :  { %16 = vsyncpa [#allocation9], 0 }
   0x3   :  { %17 = vsyncpa [#allocation12], 0 }
   0x4   :  { %18 = vsyncpa [#allocation4], 0  ;;  %s1088_s30 = smov [#allocation5]   ;;  %s924_s13 = scalar_lea.hbm %s1308_s1, 1024 }
   0x5   :  { %s34_s10 = sshll.u32 %s1088_s30, 4  ;;  %p925_p0 = scmp.ne.s32.totalorder %s1308_s1, %s924_s13  ;;  %s35_s10 = int_to_ptr.vmem [resolvable:$true] %s34_s10 }
   0x6   :  { %p928_p1 = scmp.lt.u32.totalorder %s924_s13, %s1308_s1 }
   0x8   :  { %p930_p2 = pnand %p928_p1, %p925_p0 }
   0xa   :  { %933 = shalt.err (!%p930_p2)
}
   0xb   :  { %s934_s18 = scalar_lea.vmem %s35_s10, 1024  ;;  %p939_p4 = scmp.lt.s32.totalorder %s35_s10, %s35_s10 }
   0xc   :  { %p935_p3 = scmp.ne.s32.totalorder %s35_s10, %s934_s18  ;;  %p940_p5 = scmp.lt.s32.totalorder %s934_s18, %s934_s18 }
   0xe   :  { %p941_p6 = por %p940_p5, %p939_p4 }
  0x10   :  { %p942_p7 = pnand %p941_p6, %p935_p3 }
  0x12   :  { %945 = shalt.err (!%p942_p7)
}
  0x13   :  { %s1089_s19 = smov 64   ;;  %s1090_s20 = smov 4  }
  0x14   :  { %40 = dma.hbm_to_vmem [thread:$0]  %s1308_s1, 1024, %s35_s10, [#allocation6], %s1089_s19, %s1089_s19, %s1090_s20  }
  0x15   :  { %s1091_s23 = smov [#allocation8]   ;;  %s1092_s25 = smov [#allocation2]  }
  0x16   :  { %s60_s24 = sshll.u32 %s1091_s23, 4  ;;  %s25_s26 = sshll.u32 %s1092_s25, 4  ;;  %s61_s24 = int_to_ptr.vmem [resolvable:$true] %s60_s24  ;;  %s26_s26 = int_to_ptr.vmem [resolvable:$true] %s25_s26 }
  0x17   :  { %s946_s29 = scalar_lea.hbm %s1311_s4, 1024 }
  0x18   :  { %p947_p8 = scmp.ne.s32.totalorder %s1311_s4, %s946_s29  ;;  %p950_p9 = scmp.lt.u32.totalorder %s946_s29, %s1311_s4 }
  0x1a   :  { %p952_p10 = pnand %p950_p9, %p947_p8 }
  0x1c   :  { %955 = shalt.err (!%p952_p10)
}
  0x1d   :  { %s956_s1 = scalar_lea.vmem %s61_s24, 1024  ;;  %p961_p12 = scmp.lt.s32.totalorder %s61_s24, %s61_s24 }
  0x1e   :  { %p957_p11 = scmp.ne.s32.totalorder %s61_s24, %s956_s1  ;;  %p962_p13 = scmp.lt.s32.totalorder %s956_s1, %s956_s1 }
  0x20   :  { %p963_p0 = por %p962_p13, %p961_p12 }
  0x22   :  { %p964_p1 = pnand %p963_p0, %p957_p11 }
  0x24   :  { %967 = shalt.err (!%p964_p1)
}
  0x25   :  { %66 = dma.hbm_to_vmem [thread:$0]  %s1311_s4, 1024, %s61_s24, [#allocation9], %s1089_s19, %s1089_s19, %s1090_s20  }
  0x26   :  { %s968_s17 = scalar_lea.hbm %s1307_s0, 64 }
  0x27   :  { %p969_p2 = scmp.ne.s32.totalorder %s1307_s0, %s968_s17  ;;  %p972_p3 = scmp.lt.u32.totalorder %s968_s17, %s1307_s0 }
  0x29   :  { %p974_p4 = pnand %p972_p3, %p969_p2 }
  0x2b   :  { %977 = shalt.err (!%p974_p4)
}
  0x2c   :  { %s978_s25 = scalar_lea.vmem %s26_s26, 64  ;;  %p983_p6 = scmp.lt.s32.totalorder %s26_s26, %s26_s26 }
  0x2d   :  { %p979_p5 = scmp.ne.s32.totalorder %s26_s26, %s978_s25  ;;  %p984_p7 = scmp.lt.s32.totalorder %s978_s25, %s978_s25 }
  0x2f   :  { %p985_p8 = por %p984_p7, %p983_p6 }
  0x31   :  { %p986_p9 = pnand %p985_p8, %p979_p5 }
  0x33   :  { %989 = shalt.err (!%p986_p9)
}
  0x34   :  { %28 = dma.hbm_to_vmem [thread:$0]  %s1307_s0, 64, %s26_s26, [#allocation3]  }
  0x35   :  { %s1093_s27 = smov [#allocation7]   ;;  %s1094_s29 = smov [#allocation10]  }
  0x36   :  { %s48_s28 = sshll.u32 %s1093_s27, 4  ;;  %s74_s30 = sshll.u32 %s1094_s29, 4  ;;  %s49_s28 = int_to_ptr.vmem [resolvable:$true] %s48_s28  ;;  %s75_s30 = int_to_ptr.vmem [resolvable:$true] %s74_s30 }
  0x37   :  { %s990_s13 = scalar_lea.hbm %s1310_s3, 1024 }
  0x38   :  { %p991_p10 = scmp.ne.s32.totalorder %s1310_s3, %s990_s13  ;;  %p994_p11 = scmp.lt.u32.totalorder %s990_s13, %s1310_s3 }
  0x3a   :  { %p996_p12 = pnand %p994_p11, %p991_p10 }
  0x3c   :  { %999 = shalt.err (!%p996_p12)
}
  0x3d   :  { %s1000_s0 = scalar_lea.vmem %s49_s28, 1024  ;;  %p1005_p0 = scmp.lt.s32.totalorder %s49_s28, %s49_s28 }
  0x3e   :  { %p1001_p13 = scmp.ne.s32.totalorder %s49_s28, %s1000_s0  ;;  %p1006_p1 = scmp.lt.s32.totalorder %s1000_s0, %s1000_s0 }
  0x40   :  { %p1007_p2 = por %p1006_p1, %p1005_p0 }
  0x42   :  { %p1008_p3 = pnand %p1007_p2, %p1001_p13 }
  0x44   :  { %1011 = shalt.err (!%p1008_p3)
}
  0x45   :  { %54 = dma.hbm_to_vmem [thread:$0]  %s1310_s3, 1024, %s49_s28, [#allocation6], %s1089_s19, %s1089_s19, %s1090_s20  }
  0x46   :  { %s1012_s21 = scalar_lea.hbm %s1313_s6, 1024 }
  0x47   :  { %p1013_p4 = scmp.ne.s32.totalorder %s1313_s6, %s1012_s21  ;;  %p1016_p5 = scmp.lt.u32.totalorder %s1012_s21, %s1313_s6 }
  0x49   :  { %p1018_p6 = pnand %p1016_p5, %p1013_p4 }
  0x4b   :  { %1021 = shalt.err (!%p1018_p6)
}
  0x4c   :  { %s1022_s24 = scalar_lea.vmem %s75_s30, 1024  ;;  %p1027_p8 = scmp.lt.s32.totalorder %s75_s30, %s75_s30 }
  0x4d   :  { %p1023_p7 = scmp.ne.s32.totalorder %s75_s30, %s1022_s24  ;;  %p1028_p9 = scmp.lt.s32.totalorder %s1022_s24, %s1022_s24 }
  0x4f   :  { %p1029_p10 = por %p1028_p9, %p1027_p8 }
  0x51   :  { %p1030_p11 = pnand %p1029_p10, %p1023_p7 }
  0x53   :  { %1033 = shalt.err (!%p1030_p11)
}
  0x54   :  { %80 = dma.hbm_to_vmem [thread:$0]  %s1313_s6, 1024, %s75_s30, [#allocation9], %s1089_s19, %s1089_s19, %s1090_s20  }
  0x55   :  { %s1095_s28 = smov [#allocation11]   ;;  %s1034_s13 = scalar_lea.hbm %s1314_s7, 1024 }
  0x56   :  { %s86_s29 = sshll.u32 %s1095_s28, 4  ;;  %p1035_p12 = scmp.ne.s32.totalorder %s1314_s7, %s1034_s13  ;;  %s87_s29 = int_to_ptr.vmem [resolvable:$true] %s86_s29 }
  0x57   :  { %p1038_p13 = scmp.lt.u32.totalorder %s1034_s13, %s1314_s7 }
  0x59   :  { %p1040_p0 = pnand %p1038_p13, %p1035_p12 }
  0x5b   :  { %1043 = shalt.err (!%p1040_p0)
}
  0x5c   :  { %s1044_s0 = scalar_lea.vmem %s87_s29, 1024  ;;  %p1049_p2 = scmp.lt.s32.totalorder %s87_s29, %s87_s29 }
  0x5d   :  { %p1045_p1 = scmp.ne.s32.totalorder %s87_s29, %s1044_s0  ;;  %p1050_p3 = scmp.lt.s32.totalorder %s1044_s0, %s1044_s0 }
  0x5f   :  { %p1051_p4 = por %p1050_p3, %p1049_p2 }
  0x61   :  { %p1052_p5 = pnand %p1051_p4, %p1045_p1 }
  0x63   :  { %1055 = shalt.err (!%p1052_p5)
}
  0x64   :  { %92 = dma.hbm_to_vmem [thread:$0]  %s1314_s7, 1024, %s87_s29, [#allocation12], %s1089_s19, %s1089_s19, %s1090_s20  }
  0x65   :  { %1078 = dma.done.wait [#allocation3], 64  }
  0x66   :  { %1079 = vsyncadd [#allocation3], 4294967232 }
  0x67   :  { %1080 = dma.done.wait [#allocation6], 2048  }
  0x68   :  { %1081 = vsyncadd [#allocation6], 4294965248 }
  0x69   :  { %1082 = dma.done.wait [#allocation9], 2048  }
  0x6a   :  { %1083 = vsyncadd [#allocation9], 4294965248 }
  0x6b   :  { %1084 = dma.done.wait [#allocation12], 1024  }
  0x6c   :  { %1085 = vsyncadd [#allocation12], 4294966272  ;;  %v1096_v0 = vmov 0.0   ;;  %vm1097_vm0 = vmmov 0   ;;  %v884_v1 = vld [vmem:[#allocation5] sm:$0xff]   ;;  %v885_v2 = vld [vmem:[#allocation5 + $0x8] sm:$0xff]  }
  0x6d   :  { %773 = vmatprep.subr.bf16.mxu0 %v1096_v0  ;;  %789 = vmatprep.mubr.msk.bf16.mxu0 %vm1097_vm0, %v1096_v0  ;;  %v886_v3 = vld [vmem:[#allocation5 + $0x10] sm:$0xff]   ;;  %v892_v4 = vld [vmem:[#allocation8] sm:$0xff]   ;;  %v887_v5 = vld [vmem:[#allocation5 + $0x18] sm:$0xff]  }
  0x6e   :  { %793 = vmatprep.subr.bf16.mxu1 %v1096_v0  ;;  %809 = vmatprep.mubr.msk.bf16.mxu1 %vm1097_vm0, %v1096_v0  ;;  %v894_v6 = vld [vmem:[#allocation8 + $0x8] sm:$0xff]   ;;  %v888_v7 = vld [vmem:[#allocation5 + $0x20] sm:$0xff]   ;;  %v896_v8 = vld [vmem:[#allocation8 + $0x10] sm:$0xff]  }
  0x6f   :  { %774 = vmatpush3.bf16.msra.mxu0 %v884_v1  ;;  %794 = vmatpush3.bf16.msra.mxu1 %v892_v4  ;;  %v889_v9 = vld [vmem:[#allocation5 + $0x28] sm:$0xff]   ;;  %v898_v10 = vld [vmem:[#allocation8 + $0x18] sm:$0xff]   ;;  %v890_v11 = vld [vmem:[#allocation5 + $0x30] sm:$0xff]  }
  0x70   :  { %775 = vmatprep.subr.bf16.mxu0 %v1096_v0  ;;  %795 = vmatprep.subr.bf16.mxu1 %v1096_v0  ;;  %v900_v12 = vld [vmem:[#allocation8 + $0x20] sm:$0xff]   ;;  %v891_v13 = vld [vmem:[#allocation5 + $0x38] sm:$0xff]   ;;  %v902_v14 = vld [vmem:[#allocation8 + $0x28] sm:$0xff]  }
  0x71   :  { %v114_v15 = vld [vmem:[#allocation2] sm:$0xf]  ;;  %v893_v16 = vld [vmem:[#allocation7] sm:$0xff]   ;;  %v895_v17 = vld [vmem:[#allocation7 + $0x8] sm:$0xff]  }
  0x72   :  { %v897_v18 = vld [vmem:[#allocation7 + $0x10] sm:$0xff]   ;;  %v899_v19 = vld [vmem:[#allocation7 + $0x18] sm:$0xff]   ;;  %v901_v20 = vld [vmem:[#allocation7 + $0x20] sm:$0xff]  }
  0x73   :  { %776 = vmatpush3.bf16.msra.mxu0 %v885_v2  ;;  %796 = vmatpush3.bf16.msra.mxu1 %v894_v6  ;;  %v903_v21 = vld [vmem:[#allocation7 + $0x28] sm:$0xff]   ;;  %v904_v22 = vld [vmem:[#allocation8 + $0x30] sm:$0xff]   ;;  %v906_v24 = vld [vmem:[#allocation8 + $0x38] sm:$0xff]  }
  0x74   :  { %777 = vmatprep.subr.bf16.mxu0 %v1096_v0  ;;  %797 = vmatprep.subr.bf16.mxu1 %v1096_v0  ;;  %v905_v23 = vld [vmem:[#allocation7 + $0x30] sm:$0xff]   ;;  %v907_v25 = vld [vmem:[#allocation7 + $0x38] sm:$0xff]   ;;  %v908_v34 = vld [vmem:[#allocation11] sm:$0xff]  }
  0x75   :  { %v685_v26 = vld [vmem:[%s1309_s2] ss:$0 sm:$0xff]  ;;  %v909_v35 = vld [vmem:[#allocation10] sm:$0xff]   ;;  %v910_v38 = vld [vmem:[#allocation11 + $0x8] sm:$0xff]  }
  0x76   :  { %v911_v39 = vld [vmem:[#allocation10 + $0x8] sm:$0xff]   ;;  %v912_v40 = vld [vmem:[#allocation11 + $0x10] sm:$0xff]   ;;  %v914_v42 = vld [vmem:[#allocation11 + $0x18] sm:$0xff]  }
  0x77   :  { %778 = vmatpush3.bf16.msra.mxu0 %v886_v3  ;;  %798 = vmatpush3.bf16.msra.mxu1 %v896_v8  ;;  %v913_v41 = vld [vmem:[#allocation10 + $0x10] sm:$0xff]   ;;  %v915_v43 = vld [vmem:[#allocation10 + $0x18] sm:$0xff]   ;;  %v916_v44 = vld [vmem:[#allocation11 + $0x20] sm:$0xff]  }
  0x78   :  { %779 = vmatprep.subr.bf16.mxu0 %v1096_v0  ;;  %799 = vmatprep.subr.bf16.mxu1 %v1096_v0  ;;  %v917_v45 = vld [vmem:[#allocation10 + $0x20] sm:$0xff]   ;;  %v918_v46 = vld [vmem:[#allocation11 + $0x28] sm:$0xff]   ;;  %v920_v48 = vld [vmem:[#allocation11 + $0x30] sm:$0xff]  }
  0x79   :  { %v919_v47 = vld [vmem:[#allocation10 + $0x28] sm:$0xff]   ;;  %v921_v49 = vld [vmem:[#allocation10 + $0x30] sm:$0xff]   ;;  %v922_v50 = vld [vmem:[#allocation11 + $0x38] sm:$0xff]  }
  0x7a   :  { %v923_v51 = vld [vmem:[#allocation10 + $0x38] sm:$0xff]  }
  0x7b   :  { %780 = vmatpush3.bf16.msra.mxu0 %v887_v5  ;;  %800 = vmatpush3.bf16.msra.mxu1 %v898_v10  ;;  %v710_v54 = vld [vmem:[%s1312_s5] ss:$0 sm:$0xff]  ;;  %s1098_s5 = smov [#allocation13]  }
  0x7c   :  { %781 = vmatprep.subr.bf16.mxu0 %v1096_v0  ;;  %801 = vmatprep.subr.bf16.mxu1 %v1096_v0  ;;  %v727_v5 = vld [vmem:[%s1315_s8] ss:$0 sm:$0xff]  ;;  %s673_s17 = sshll.u32 %s1098_s5, 4  ;;  %s674_s17 = int_to_ptr.vmem [resolvable:$true] %s673_s17 }
  0x7d   :  { %s1056_s18 = scalar_lea.vmem %s674_s17, 128  ;;  %p1061_p7 = scmp.lt.s32.totalorder %s674_s17, %s674_s17 }
  0x7e   :  { %p1057_p6 = scmp.ne.s32.totalorder %s674_s17, %s1056_s18  ;;  %p1062_p8 = scmp.lt.s32.totalorder %s1056_s18, %s1056_s18 }
  0x7f   :  { %782 = vmatpush3.bf16.msra.mxu0 %v888_v7  ;;  %802 = vmatpush3.bf16.msra.mxu1 %v900_v12 }
  0x80   :  { %783 = vmatprep.subr.bf16.mxu0 %v1096_v0  ;;  %803 = vmatprep.subr.bf16.mxu1 %v1096_v0  ;;  %p1063_p9 = por %p1062_p8, %p1061_p7 }
  0x82   :  { %p1064_p10 = pnand %p1063_p9, %p1057_p6 }
  0x83   :  { %784 = vmatpush3.bf16.msra.mxu0 %v889_v9  ;;  %804 = vmatpush3.bf16.msra.mxu1 %v902_v14 }
  0x84   :  { %785 = vmatprep.subr.bf16.mxu0 %v1096_v0  ;;  %805 = vmatprep.subr.bf16.mxu1 %v1096_v0 }
  0x87   :  { %786 = vmatpush3.bf16.msra.mxu0 %v890_v11  ;;  %806 = vmatpush3.bf16.msra.mxu1 %v904_v22 }
  0x88   :  { %787 = vmatprep.subr.bf16.mxu0 %v1096_v0  ;;  %807 = vmatprep.subr.bf16.mxu1 %v1096_v0 }
  0x8b   :  { %788 = vmatpush3.bf16.msra.mxu0 %v891_v13  ;;  %808 = vmatpush3.bf16.msra.mxu1 %v906_v24 }
  0x8c   :  { %813 = vmatprep.subr.bf16.mxu0 %v1096_v0  ;;  %833 = vmatprep.subr.bf16.mxu1 %v1096_v0 }
  0x8e   :  { %790 = vmatmul.mubr.bf16.vlgmr.msra.gmra.mrb[0].mxu0 %v114_v15 }
  0x8f   :  { %814 = vmatpush3.bf16.msra.mxu0 %v893_v16  ;;  %829 = vmatprep.mubr.msk.bf16.mxu0 %vm1097_vm0, %v1096_v0 }
  0x90   :  { %815 = vmatprep.subr.bf16.mxu0 %v1096_v0 }
  0x93   :  { %816 = vmatpush3.bf16.msra.mxu0 %v895_v17 }
  0x94   :  { %817 = vmatprep.subr.bf16.mxu0 %v1096_v0 }
  0x97   :  { %818 = vmatpush3.bf16.msra.mxu0 %v897_v18 }
  0x98   :  { %819 = vmatprep.subr.bf16.mxu0 %v1096_v0 }
  0x9b   :  { %820 = vmatpush3.bf16.msra.mxu0 %v899_v19 }
  0x9c   :  { %821 = vmatprep.subr.bf16.mxu0 %v1096_v0 }
  0x9f   :  { %822 = vmatpush3.bf16.msra.mxu0 %v901_v20 }
  0xa0   :  { %823 = vmatprep.subr.bf16.mxu0 %v1096_v0 }
  0xa3   :  { %824 = vmatpush3.bf16.msra.mxu0 %v903_v21 }
  0xa4   :  { %825 = vmatprep.subr.bf16.mxu0 %v1096_v0 }
  0xa7   :  { %826 = vmatpush3.bf16.msra.mxu0 %v905_v23 }
  0xa8   :  { %827 = vmatprep.subr.bf16.mxu0 %v1096_v0 }
  0xab   :  { %828 = vmatpush3.bf16.msra.mxu0 %v907_v25 }
  0xac   :  { %853 = vmatprep.subr.bf16.mxu0 %v1096_v0 }
 0x161   :  { %v220_v27 = vpop.f32.mrb[0].mxu0 }
 0x162   :  { %v221_v28 = vadd.f32 %v685_v26, %v220_v27  ;;  %v791_v29 = vpop.f32.mrb[1].mxu0 }
 0x163   :  { %v223_v30 = vpop.f32.mrb[2].mxu0 }
 0x164   :  { %v226_v31 = vmax.f32 %v221_v28, 0.0  ;;  %v244_v32 = vmin.f32 %v221_v28, 0.0  ;;  %v792_v33 = vpop.f32.mrb[3].mxu0 }
 0x166   :  { %v227_v36 = vpack.c.bf16 %v226_v31, %v226_v31  ;;  %v245_v37 = vpack.c.bf16 %v244_v32, %v244_v32 }
 0x168   :  { %810 = vmatmul.mubr.bf16.vlgmr.msra.gmra.mrb[0].mxu1 %v245_v37  ;;  %830 = vmatmul.mubr.bf16.vlgmr.msra.gmra.mrb[4].mxu0 %v227_v36 }
 0x169   :  { %834 = vmatpush3.bf16.msra.mxu1 %v908_v34  ;;  %854 = vmatpush3.bf16.msra.mxu0 %v909_v35 }
 0x16a   :  { %835 = vmatprep.subr.bf16.mxu1 %v1096_v0  ;;  %855 = vmatprep.subr.bf16.mxu0 %v1096_v0 }
 0x16b   :  { %849 = vmatprep.mubr.msk.bf16.mxu1 %vm1097_vm0, %v1096_v0  ;;  %869 = vmatprep.mubr.msk.bf16.mxu0 %vm1097_vm0, %v1096_v0 }
 0x16d   :  { %836 = vmatpush3.bf16.msra.mxu1 %v910_v38  ;;  %856 = vmatpush3.bf16.msra.mxu0 %v911_v39 }
 0x16e   :  { %837 = vmatprep.subr.bf16.mxu1 %v1096_v0  ;;  %857 = vmatprep.subr.bf16.mxu0 %v1096_v0 }
 0x171   :  { %838 = vmatpush3.bf16.msra.mxu1 %v912_v40  ;;  %858 = vmatpush3.bf16.msra.mxu0 %v913_v41 }
 0x172   :  { %839 = vmatprep.subr.bf16.mxu1 %v1096_v0  ;;  %859 = vmatprep.subr.bf16.mxu0 %v1096_v0 }
 0x175   :  { %840 = vmatpush3.bf16.msra.mxu1 %v914_v42  ;;  %860 = vmatpush3.bf16.msra.mxu0 %v915_v43 }
 0x176   :  { %841 = vmatprep.subr.bf16.mxu1 %v1096_v0  ;;  %861 = vmatprep.subr.bf16.mxu0 %v1096_v0 }
 0x179   :  { %842 = vmatpush3.bf16.msra.mxu1 %v916_v44  ;;  %862 = vmatpush3.bf16.msra.mxu0 %v917_v45 }
 0x17a   :  { %843 = vmatprep.subr.bf16.mxu1 %v1096_v0  ;;  %863 = vmatprep.subr.bf16.mxu0 %v1096_v0 }
 0x17d   :  { %844 = vmatpush3.bf16.msra.mxu1 %v918_v46  ;;  %864 = vmatpush3.bf16.msra.mxu0 %v919_v47 }
 0x17e   :  { %845 = vmatprep.subr.bf16.mxu1 %v1096_v0  ;;  %865 = vmatprep.subr.bf16.mxu0 %v1096_v0 }
 0x181   :  { %846 = vmatpush3.bf16.msra.mxu1 %v920_v48  ;;  %866 = vmatpush3.bf16.msra.mxu0 %v921_v49 }
 0x182   :  { %847 = vmatprep.subr.bf16.mxu1 %v1096_v0  ;;  %867 = vmatprep.subr.bf16.mxu0 %v1096_v0 }
 0x185   :  { %848 = vmatpush3.bf16.msra.mxu1 %v922_v50  ;;  %868 = vmatpush3.bf16.msra.mxu0 %v923_v51 }
 0x23b   :  { %v344_v52 = vpop.f32.mrb[0].mxu1  ;;  %v432_v53 = vpop.f32.mrb[4].mxu0 }
 0x23c   :  { %v433_v55 = vadd.f32 %v432_v53, %v344_v52  ;;  %v811_v56 = vpop.f32.mrb[1].mxu1  ;;  %v831_v57 = vpop.f32.mrb[5].mxu0 }
 0x23d   :  { %v347_v58 = vpop.f32.mrb[2].mxu1  ;;  %v435_v59 = vpop.f32.mrb[6].mxu0 }
 0x23e   :  { %v445_v60 = vadd.f32 %v710_v54, %v433_v55  ;;  %v812_v61 = vpop.f32.mrb[3].mxu1  ;;  %v832_v62 = vpop.f32.mrb[7].mxu0 }
 0x240   :  { %v446_v63 = vmax.f32 %v445_v60, 0.0  ;;  %v464_v0 = vmin.f32 %v445_v60, 0.0 }
 0x242   :  { %v447_v1 = vpack.c.bf16 %v446_v63, %v446_v63  ;;  %v465_v2 = vpack.c.bf16 %v464_v0, %v464_v0 }
 0x244   :  { %850 = vmatmul.mubr.bf16.vlgmr.msra.gmra.mrb[4].mxu1 %v465_v2  ;;  %870 = vmatmul.mubr.bf16.vlgmr.msra.gmra.mrb[8].mxu0 %v447_v1 }
 0x317   :  { %v564_v3 = vpop.f32.mrb[4].mxu1  ;;  %v652_v4 = vpop.f32.mrb[8].mxu0 }
 0x318   :  { %v653_v6 = vadd.f32 %v652_v4, %v564_v3  ;;  %v851_v7 = vpop.f32.mrb[5].mxu1  ;;  %v871_v8 = vpop.f32.mrb[9].mxu0 }
 0x319   :  { %v567_v9 = vpop.f32.mrb[6].mxu1  ;;  %v655_v10 = vpop.f32.mrb[10].mxu0 }
 0x31a   :  { %v665_v11 = vadd.f32 %v727_v5, %v653_v6  ;;  %v852_v12 = vpop.f32.mrb[7].mxu1  ;;  %v872_v13 = vpop.f32.mrb[11].mxu0 }
 0x31c   :  { %666 = vst [vmem:[#allocation13] sm:$0xff] %v665_v11 }
 0x31d   :  { %1067 = shalt.err (!%p1064_p10)
}
 0x31e   :  { %s1068_s22 = scalar_lea.hbm %s1316_s9, 128 }
 0x31f   :  { %p1069_p11 = scmp.ne.s32.totalorder %s1316_s9, %s1068_s22  ;;  %p1072_p12 = scmp.lt.u32.totalorder %s1068_s22, %s1316_s9 }
 0x321   :  { %p1074_p13 = pnand %p1072_p12, %p1069_p11 }
 0x323   :  { %1077 = shalt.err (!%p1074_p13)
}
 0x324   :  { %676 = dma.vmem_to_hbm [thread:$0]  %s674_s17, 128, %s1316_s9, [#allocation4]  }
 0x325   :  { %1086 = dma.done.wait [#allocation4], 128  }
 0x326   :  { %1087 = vsyncadd [#allocation4], 4294967168 }
 0x327   :  { %680 = vsyncpa [#allocation3], 1 }
 0x328   :  { %681 = vsyncpa [#allocation6], 1 }
 0x329   :  { %682 = vsyncpa [#allocation9], 1 }
 0x32a   :  { %683 = vsyncpa [#allocation12], 1 }
 0x32b   :  { %684 = vsyncpa [#allocation4], 1 }

</bundles_post_ra>
